<compile_context>
chip_gen: v5e
topology: v5e:2x2
jax: 0.10.0
libtpu: 0.0.40
codegen_flags: <defaults>
</compile_context>

<pallas_src>
import functools

import jax
import jax.numpy as jnp
from jax.experimental import pallas as pl
from jax.experimental.pallas import tpu as pltpu


def _relevance_kernel(news_ref, tau_ref, ctr_ref, av_ref, epi_ref,
                      table_ref, t2v_w_ref, t2v_b_ref,
                      w_fused_ref, b_fused_ref, scalars_ref, o_ref,
                      *, matrix_size):
    news = news_ref[...]                       # (B, E)  f32
    tau = tau_ref[...]                         # (B, 1)  f32
    ctr = ctr_ref[...]                         # (B, 1)  f32

    b_rows = news_ref.shape[0]
    e_dim = news_ref.shape[1]
    num_emb, u_dim = table_ref.shape
    t_m1 = t2v_w_ref.shape[1]                  # time_emb_dim - 1

    # ---- nn.Embedding(epi_idx * matrix_size + av_idx) as a one-hot MXU matmul ----
    idx = epi_ref[...] * matrix_size + av_ref[...]                        # (B, 1) int32
    lane_ids = jax.lax.broadcasted_iota(jnp.int32, (b_rows, num_emb), 1)  # (B, num_emb)
    one_hot = (lane_ids == idx).astype(jnp.float32)                       # (B, num_emb)
    user_eng = jnp.dot(one_hot, table_ref[...],
                       preferred_element_type=jnp.float32)                # (B, U)

    # ---- Time2Vec sine activation: te = [sin(tau*w + b), tau*w0 + b0] ----
    # (tau @ w with tau:(B,1), w:(1,T-1) is a rank-1 outer product -> plain VPU broadcast)
    t2v_w0 = scalars_ref[:, 2:3]               # (1, 1)
    t2v_b0 = scalars_ref[:, 3:4]               # (1, 1)
    te_sin = jnp.sin(tau * t2v_w_ref[...] + t2v_b_ref[...])               # (B, T-1)
    te_lin = tau * t2v_w0 + t2v_b0                                        # (B, 1)

    # ---- Fused heads: [rel_hat_ic, rel_hat_nctx, gate_logit] ----
    # Equivalent to concat([news, user_eng, te_sin, te_lin], -1) @ W_fused + b_fused,
    # evaluated block-row-wise so no lane-dim concatenation is required in-kernel.
    fused = (jnp.dot(news, w_fused_ref[0:e_dim, :],
                     preferred_element_type=jnp.float32)
             + jnp.dot(user_eng, w_fused_ref[e_dim:e_dim + u_dim, :],
                       preferred_element_type=jnp.float32)
             + jnp.dot(te_sin, w_fused_ref[e_dim + u_dim:e_dim + u_dim + t_m1, :],
                       preferred_element_type=jnp.float32)
             + te_lin * w_fused_ref[e_dim + u_dim + t_m1:e_dim + u_dim + t_m1 + 1, :]
             + b_fused_ref[...])                                          # (B, 3)

    rel_hat_ic = fused[:, 0:1]                 # dense_news(news_emb)
    rel_hat_nctx = fused[:, 1:2]               # dense_news_ctx(news_ctx)
    theta = jax.nn.sigmoid(fused[:, 2:3])      # sigmoid(gate(concat_emb))

    r_hat = theta * rel_hat_ic + (1.0 - theta) * rel_hat_nctx             # (B, 1)

    w_ctr = scalars_ref[:, 0:1]
    w_r_hat = scalars_ref[:, 1:2]
    score = ctr * w_ctr + r_hat * w_r_hat                                 # (B, 1)
    o_ref[...] = jax.nn.sigmoid(score).astype(o_ref.dtype)


def avoidance_aware_relevance_predictor(news_emb, time_elapsed, ctr, av_idx, epi_idx,
                                        params, *, matrix_size):
    """Forward pass of AvoidanceAwareRelevancePredictor as a single Pallas call.

    news_emb: (B, E) f32; time_elapsed, ctr: (B,) f32; av_idx, epi_idx: (B,) int.
    Returns (B,) f32 relevance scores in (0, 1).
    """
    batch, e_dim = news_emb.shape
    num_emb, u_dim = params["emb_table"].shape
    t_dim = params["t2v_w"].shape[1] + 1

    # Fold the three 1-wide Linear layers into one (E+U+T, 3) weight:
    #   column 0 = dense_news   (non-zero only on the news block)
    #   column 1 = dense_news_ctx (non-zero only on the [user_eng, te] block)
    #   column 2 = gate          (full concat_emb = [news, user_eng, te])
    w_fused = jnp.zeros((e_dim + u_dim + t_dim, 3), jnp.float32)
    w_fused = w_fused.at[:e_dim, 0].set(params["w_news"][:, 0])
    w_fused = w_fused.at[e_dim:, 1].set(params["w_ctx"][:, 0])
    w_fused = w_fused.at[:, 2].set(params["w_gate"][:, 0])
    b_fused = jnp.stack([params["b_news"], params["b_ctx"], params["b_gate"]]
                        ).reshape(1, 3).astype(jnp.float32)
    scalars = jnp.stack([params["w_ctr"], params["w_r_hat"],
                         params["t2v_w0"], params["t2v_b0"]]
                        ).reshape(1, 4).astype(jnp.float32)

    # Pad the batch to a multiple of 8 sublanes (no-op when batch % 8 == 0).
    padded = ((batch + 7) // 8) * 8
    pad = padded - batch

    def pad_rows(x):
        return jnp.pad(x, ((0, pad),) + ((0, 0),) * (x.ndim - 1)) if pad else x

    news_p = pad_rows(news_emb.astype(jnp.float32))
    tau_p = pad_rows(time_elapsed.astype(jnp.float32)[:, None])
    ctr_p = pad_rows(ctr.astype(jnp.float32)[:, None])
    av_p = pad_rows(av_idx.astype(jnp.int32)[:, None])
    epi_p = pad_rows(epi_idx.astype(jnp.int32)[:, None])

    vmem = pl.BlockSpec(memory_space=pltpu.MemorySpace.VMEM)
    out = pl.pallas_call(
        functools.partial(_relevance_kernel, matrix_size=matrix_size),
        out_shape=jax.ShapeDtypeStruct((padded, 1), jnp.float32),
        in_specs=[vmem] * 11,
        out_specs=vmem,
    )(news_p, tau_p, ctr_p, av_p, epi_p,
      params["emb_table"].astype(jnp.float32),
      params["t2v_w"].astype(jnp.float32),
      params["t2v_b"].astype(jnp.float32),
      w_fused, b_fused, scalars)
    return out[:batch, 0]


def _reference(news_emb, time_elapsed, ctr, av_idx, epi_idx, params, *, matrix_size):
    """Pure-JAX mirror of the PyTorch forward pass."""
    idx = epi_idx.astype(jnp.int32) * matrix_size + av_idx.astype(jnp.int32)
    user_eng = params["emb_table"][idx]                            # nn.Embedding gather
    tau = time_elapsed[:, None]
    # TODO(synk): Time2VecSineActivation assumed to be the standard t2v sine form
    # concat([sin(tau*w + b), tau*w0 + b0]); flip the concat order here and in the
    # w_fused row layout above if the repo version concatenates the other way.
    te_sin = jnp.sin(tau * params["t2v_w"] + params["t2v_b"])
    te_lin = tau * params["t2v_w0"] + params["t2v_b0"]
    te_emb = jnp.concatenate([te_sin, te_lin], axis=-1)
    news_ctx = jnp.concatenate([user_eng, te_emb], axis=-1)
    rel_hat_ic = news_emb @ params["w_news"] + params["b_news"]
    rel_hat_nctx = news_ctx @ params["w_ctx"] + params["b_ctx"]
    concat_emb = jnp.concatenate([news_emb, news_ctx], axis=-1)
    theta = jax.nn.sigmoid(concat_emb @ params["w_gate"] + params["b_gate"])
    r_hat = theta * rel_hat_ic + (1.0 - theta) * rel_hat_nctx
    score = ctr * params["w_ctr"] + r_hat[:, 0] * params["w_r_hat"]
    return jax.nn.sigmoid(score)


if __name__ == "__main__":
    batch = 8
    news_embed_dim = 64
    time_emb_dim = 16
    usr_eng_emb_dim = 16
    matrix_size = 8
    usr_eng_num_emb = matrix_size * matrix_size    # epi_idx * matrix_size + av_idx < num_emb

    key = jax.random.PRNGKey(0)
    ks = jax.random.split(key, 18)

    news_emb = jax.random.normal(ks[0], (batch, news_embed_dim), dtype=jnp.float32)
    time_elapsed = jax.random.uniform(ks[1], (batch,), dtype=jnp.float32)
    ctr = jax.random.uniform(ks[2], (batch,), dtype=jnp.float32)
    av_idx = jax.random.randint(ks[3], (batch,), 0, matrix_size, dtype=jnp.int32)
    epi_idx = jax.random.randint(ks[4], (batch,), 0, usr_eng_num_emb // matrix_size,
                                 dtype=jnp.int32)

    ctx_dim = usr_eng_emb_dim + time_emb_dim
    params = {
        # nn.Linear weights stored pre-transposed as (in, out).
        "w_news": jax.random.normal(ks[5], (news_embed_dim, 1), dtype=jnp.float32) * 0.1,
        "b_news": jax.random.normal(ks[6], (), dtype=jnp.float32) * 0.1,
        "w_ctx": jax.random.normal(ks[7], (ctx_dim, 1), dtype=jnp.float32) * 0.1,
        "b_ctx": jax.random.normal(ks[8], (), dtype=jnp.float32) * 0.1,
        "w_gate": jax.random.normal(ks[9], (news_embed_dim + ctx_dim, 1),
                                    dtype=jnp.float32) * 0.1,
        "b_gate": jax.random.normal(ks[10], (), dtype=jnp.float32) * 0.1,
        # Embedding table rounded to bf16-representable values so the kernel's one-hot
        # MXU matmul matches the reference's exact gather regardless of the default
        # (reduced-precision) f32 matmul mode on TPU.
        "emb_table": jax.random.normal(ks[11], (usr_eng_num_emb, usr_eng_emb_dim),
                                       dtype=jnp.float32
                                       ).astype(jnp.bfloat16).astype(jnp.float32),
        # Time2Vec (sine activation) parameters.
        "t2v_w": jax.random.normal(ks[12], (1, time_emb_dim - 1), dtype=jnp.float32),
        "t2v_b": jax.random.normal(ks[13], (1, time_emb_dim - 1), dtype=jnp.float32),
        "t2v_w0": jax.random.normal(ks[14], (), dtype=jnp.float32) * 0.1,
        "t2v_b0": jax.random.normal(ks[15], (), dtype=jnp.float32) * 0.1,
        # torch.rand(1) learned mixing scalars.
        "w_ctr": jax.random.uniform(ks[16], (), dtype=jnp.float32),
        "w_r_hat": jax.random.uniform(ks[17], (), dtype=jnp.float32),
    }

    out = avoidance_aware_relevance_predictor(
        news_emb, time_elapsed, ctr, av_idx, epi_idx, params, matrix_size=matrix_size)
    out = jax.block_until_ready(out)

    ref = _reference(news_emb, time_elapsed, ctr, av_idx, epi_idx, params,
                     matrix_size=matrix_size)

    assert out.shape == (batch,)
    assert bool(jnp.all(jnp.isfinite(out)))
    # Tolerance accounts for TPU default reduced-precision f32 matmul modes possibly
    # differing between the XLA reference path and the Pallas/MXU path; structural bugs
    # would show up as O(0.1) differences.
    assert jnp.allclose(out, ref, atol=1e-3, rtol=1e-3), (
        f"mismatch vs reference: max abs diff = {jnp.max(jnp.abs(out - ref))}")

    print("KERNEL_OK")
</pallas_src>

<mosaic_0001>
module attributes {stable_mosaic.version = 11 : i64} {
  func.func @_relevance_kernel(%arg0: memref<8x64xf32, #tpu.memory_space<vmem>>, %arg1: memref<8x1xf32, #tpu.memory_space<vmem>>, %arg2: memref<8x1xf32, #tpu.memory_space<vmem>>, %arg3: memref<8x1xi32, #tpu.memory_space<vmem>>, %arg4: memref<8x1xi32, #tpu.memory_space<vmem>>, %arg5: memref<64x16xf32, #tpu.memory_space<vmem>>, %arg6: memref<1x15xf32, #tpu.memory_space<vmem>>, %arg7: memref<1x15xf32, #tpu.memory_space<vmem>>, %arg8: memref<96x3xf32, #tpu.memory_space<vmem>>, %arg9: memref<1x3xf32, #tpu.memory_space<vmem>>, %arg10: memref<1x4xf32, #tpu.memory_space<vmem>>, %arg11: memref<8x1xf32, #tpu.memory_space<vmem>>) attributes {dimension_semantics = [], scalar_prefetch = 0 : i64, scratch_operands = 0 : i64, tpu.core_type = #tpu.core_type<tc>} {
    %c0 = arith.constant 0 : index
    %c0_0 = arith.constant 0 : index
    %0 = vector.load %arg0[%c0, %c0_0] : memref<8x64xf32, #tpu.memory_space<vmem>>, vector<8x64xf32>
    %c0_1 = arith.constant 0 : index
    %c0_2 = arith.constant 0 : index
    %1 = vector.load %arg1[%c0_1, %c0_2] : memref<8x1xf32, #tpu.memory_space<vmem>>, vector<8x1xf32>
    %c0_3 = arith.constant 0 : index
    %c0_4 = arith.constant 0 : index
    %2 = vector.load %arg2[%c0_3, %c0_4] : memref<8x1xf32, #tpu.memory_space<vmem>>, vector<8x1xf32>
    %c0_5 = arith.constant 0 : index
    %c0_6 = arith.constant 0 : index
    %3 = vector.load %arg4[%c0_5, %c0_6] : memref<8x1xi32, #tpu.memory_space<vmem>>, vector<8x1xi32>
    %c8_i32 = arith.constant 8 : i32
    %4 = vector.broadcast %c8_i32 : i32 to vector<8x1xi32>
    %5 = arith.muli %3, %4 : vector<8x1xi32>
    %c0_7 = arith.constant 0 : index
    %c0_8 = arith.constant 0 : index
    %6 = vector.load %arg3[%c0_7, %c0_8] : memref<8x1xi32, #tpu.memory_space<vmem>>, vector<8x1xi32>
    %7 = arith.addi %5, %6 : vector<8x1xi32>
    %8 = tpu.iota {dimensions = array<i32: 1>} : vector<8x64xi32>
    %9 = vector.broadcast %7 : vector<8x1xi32> to vector<8x64xi32>
    %10 = arith.cmpi eq, %8, %9 : vector<8x64xi32>
    %11 = arith.extui %10 : vector<8x64xi1> to vector<8x64xi32>
    %12 = arith.sitofp %11 : vector<8x64xi32> to vector<8x64xf32>
    %c0_9 = arith.constant 0 : index
    %c0_10 = arith.constant 0 : index
    %13 = vector.load %arg5[%c0_9, %c0_10] : memref<64x16xf32, #tpu.memory_space<vmem>>, vector<64x16xf32>
    %cst = arith.constant dense<0.000000e+00> : vector<8x16xf32>
    %14 = tpu.matmul %12, %13, %cst {dimension_numbers = #tpu.dot_dimension_numbers<[1], [0], [0], [1], [0, 0, 1, 1], [], []>} : vector<8x64xf32>, vector<64x16xf32>, vector<8x16xf32> -> vector<8x16xf32>
    %c0_11 = arith.constant 0 : index
    %c2 = arith.constant 2 : index
    %15 = vector.load %arg10[%c0_11, %c2] : memref<1x4xf32, #tpu.memory_space<vmem>>, vector<1x1xf32>
    %c0_12 = arith.constant 0 : index
    %c3 = arith.constant 3 : index
    %16 = vector.load %arg10[%c0_12, %c3] : memref<1x4xf32, #tpu.memory_space<vmem>>, vector<1x1xf32>
    %c0_13 = arith.constant 0 : index
    %c0_14 = arith.constant 0 : index
    %17 = vector.load %arg6[%c0_13, %c0_14] : memref<1x15xf32, #tpu.memory_space<vmem>>, vector<1x15xf32>
    %18 = vector.broadcast %1 : vector<8x1xf32> to vector<8x15xf32>
    %19 = vector.broadcast %17 : vector<1x15xf32> to vector<8x15xf32>
    %20 = arith.mulf %18, %19 : vector<8x15xf32>
    %c0_15 = arith.constant 0 : index
    %c0_16 = arith.constant 0 : index
    %21 = vector.load %arg7[%c0_15, %c0_16] : memref<1x15xf32, #tpu.memory_space<vmem>>, vector<1x15xf32>
    %22 = vector.broadcast %21 : vector<1x15xf32> to vector<8x15xf32>
    %23 = arith.addf %20, %22 : vector<8x15xf32>
    %24 = math.sin %23 : vector<8x15xf32>
    %25 = vector.broadcast %15 : vector<1x1xf32> to vector<8x1xf32>
    %26 = arith.mulf %1, %25 : vector<8x1xf32>
    %27 = vector.broadcast %16 : vector<1x1xf32> to vector<8x1xf32>
    %28 = arith.addf %26, %27 : vector<8x1xf32>
    %c0_17 = arith.constant 0 : index
    %c0_18 = arith.constant 0 : index
    %29 = vector.load %arg8[%c0_17, %c0_18] : memref<96x3xf32, #tpu.memory_space<vmem>>, vector<64x3xf32>
    %cst_19 = arith.constant dense<0.000000e+00> : vector<8x3xf32>
    %30 = tpu.matmul %0, %29, %cst_19 {dimension_numbers = #tpu.dot_dimension_numbers<[1], [0], [0], [1], [0, 0, 1, 1], [], []>} : vector<8x64xf32>, vector<64x3xf32>, vector<8x3xf32> -> vector<8x3xf32>
    %c64 = arith.constant 64 : index
    %c0_20 = arith.constant 0 : index
    %31 = vector.load %arg8[%c64, %c0_20] : memref<96x3xf32, #tpu.memory_space<vmem>>, vector<16x3xf32>
    %cst_21 = arith.constant dense<0.000000e+00> : vector<8x3xf32>
    %32 = tpu.matmul %14, %31, %cst_21 {dimension_numbers = #tpu.dot_dimension_numbers<[1], [0], [0], [1], [0, 0, 1, 1], [], []>} : vector<8x16xf32>, vector<16x3xf32>, vector<8x3xf32> -> vector<8x3xf32>
    %33 = arith.addf %30, %32 : vector<8x3xf32>
    %c80 = arith.constant 80 : index
    %c0_22 = arith.constant 0 : index
    %34 = vector.load %arg8[%c80, %c0_22] : memref<96x3xf32, #tpu.memory_space<vmem>>, vector<15x3xf32>
    %cst_23 = arith.constant dense<0.000000e+00> : vector<8x3xf32>
    %35 = tpu.matmul %24, %34, %cst_23 {dimension_numbers = #tpu.dot_dimension_numbers<[1], [0], [0], [1], [0, 0, 1, 1], [], []>} : vector<8x15xf32>, vector<15x3xf32>, vector<8x3xf32> -> vector<8x3xf32>
    %36 = arith.addf %33, %35 : vector<8x3xf32>
    %c95 = arith.constant 95 : index
    %c0_24 = arith.constant 0 : index
    %37 = vector.load %arg8[%c95, %c0_24] : memref<96x3xf32, #tpu.memory_space<vmem>>, vector<1x3xf32>
    %38 = vector.broadcast %28 : vector<8x1xf32> to vector<8x3xf32>
    %39 = vector.broadcast %37 : vector<1x3xf32> to vector<8x3xf32>
    %40 = arith.mulf %38, %39 : vector<8x3xf32>
    %41 = arith.addf %36, %40 : vector<8x3xf32>
    %c0_25 = arith.constant 0 : index
    %c0_26 = arith.constant 0 : index
    %42 = vector.load %arg9[%c0_25, %c0_26] : memref<1x3xf32, #tpu.memory_space<vmem>>, vector<1x3xf32>
    %43 = vector.broadcast %42 : vector<1x3xf32> to vector<8x3xf32>
    %44 = arith.addf %41, %43 : vector<8x3xf32>
    %45 = vector.extract_strided_slice %44 {offsets = [0, 0], sizes = [8, 1], strides = [1, 1]} : vector<8x3xf32> to vector<8x1xf32>
    %46 = vector.extract_strided_slice %44 {offsets = [0, 1], sizes = [8, 1], strides = [1, 1]} : vector<8x3xf32> to vector<8x1xf32>
    %47 = vector.extract_strided_slice %44 {offsets = [0, 2], sizes = [8, 1], strides = [1, 1]} : vector<8x3xf32> to vector<8x1xf32>
    %48 = arith.negf %47 : vector<8x1xf32>
    %49 = math.exp %48 : vector<8x1xf32>
    %cst_27 = arith.constant 1.000000e+00 : f32
    %50 = vector.broadcast %cst_27 : f32 to vector<8x1xf32>
    %51 = arith.addf %50, %49 : vector<8x1xf32>
    %52 = arith.divf %50, %51 : vector<8x1xf32>
    %53 = arith.mulf %52, %45 : vector<8x1xf32>
    %cst_28 = arith.constant 1.000000e+00 : f32
    %54 = vector.broadcast %cst_28 : f32 to vector<8x1xf32>
    %55 = arith.subf %54, %52 : vector<8x1xf32>
    %56 = arith.mulf %55, %46 : vector<8x1xf32>
    %57 = arith.addf %53, %56 : vector<8x1xf32>
    %c0_29 = arith.constant 0 : index
    %c0_30 = arith.constant 0 : index
    %58 = vector.load %arg10[%c0_29, %c0_30] : memref<1x4xf32, #tpu.memory_space<vmem>>, vector<1x1xf32>
    %c0_31 = arith.constant 0 : index
    %c1 = arith.constant 1 : index
    %59 = vector.load %arg10[%c0_31, %c1] : memref<1x4xf32, #tpu.memory_space<vmem>>, vector<1x1xf32>
    %60 = vector.broadcast %58 : vector<1x1xf32> to vector<8x1xf32>
    %61 = arith.mulf %2, %60 : vector<8x1xf32>
    %62 = vector.broadcast %59 : vector<1x1xf32> to vector<8x1xf32>
    %63 = arith.mulf %57, %62 : vector<8x1xf32>
    %64 = arith.addf %61, %63 : vector<8x1xf32>
    %65 = arith.negf %64 : vector<8x1xf32>
    %66 = math.exp %65 : vector<8x1xf32>
    %cst_32 = arith.constant 1.000000e+00 : f32
    %67 = vector.broadcast %cst_32 : f32 to vector<8x1xf32>
    %68 = arith.addf %67, %66 : vector<8x1xf32>
    %69 = arith.divf %67, %68 : vector<8x1xf32>
    %c0_33 = arith.constant 0 : index
    %c0_34 = arith.constant 0 : index
    %70 = vector.load %arg11[%c0_33, %c0_34] : memref<8x1xf32, #tpu.memory_space<vmem>>, vector<8x1xf32>
    tpu.vector_store %arg11[%c0_33, %c0_34], %69 {strides = array<i32>} : memref<8x1xf32, #tpu.memory_space<vmem>>, vector<8x1xf32>,
    return
  }
}

</mosaic_0001>

<bundles_post_ra>
// kernel: tpu_custom_call.1
= control target key start
LH: loop header
LB: loop body
LE: loop exit
PB: predicated region body
PF: predicated region fallthrough
CT: control target
= control target key end

     0   :  { %v472_v0 = vmov 0   ;;  %v45_v14 = vlaneseq  ;;  %vm329_vm0 = vcmask 1046528   ;;  %vm61_vm1 = vcmask 523264   ;;  %s719_s3 = inlined_call_operand.vmem [shape: s32[8,1], index: 3, kind: input, shape index: {}]   ;;  %s720_s4 = inlined_call_operand.vmem [shape: s32[8,1], index: 4, kind: input, shape index: {}]   ;;  %s721_s5 = inlined_call_operand.vmem [shape: f32[64,16], index: 5, kind: input, shape index: {}]   ;;  %s722_s6 = inlined_call_operand.vmem [shape: f32[1,15], index: 6, kind: input, shape index: {}]   ;;  %s723_s7 = inlined_call_operand.vmem [shape: f32[1,15], index: 7, kind: input, shape index: {}]   ;;  %s724_s1 = inlined_call_operand.vmem [shape: f32[8,1], index: 1, kind: input, shape index: {}]   ;;  %s725_s10 = inlined_call_operand.vmem [shape: f32[1,4], index: 10, kind: input, shape index: {}]   ;;  %s726_s8 = inlined_call_operand.vmem [shape: f32[96,3], index: 8, kind: input, shape index: {}]   ;;  %s727_s0 = inlined_call_operand.vmem [shape: f32[8,64], index: 0, kind: input, shape index: {}]   ;;  %s728_s9 = inlined_call_operand.vmem [shape: f32[1,3], index: 9, kind: input, shape index: {}]   ;;  %s729_s2 = inlined_call_operand.vmem [shape: f32[8,1], index: 2, kind: input, shape index: {}]   ;;  %s730_s11 = inlined_call_operand.vmem [shape: f32[8,1], index: 11, kind: output, shape index: {}]  }
   0x1   :  { %457 = vset.pattern.permute.xlu0 %v472_v0  ;;  %v41_v1 = vld [vmem:[%s720_s4] sm:$0xff]  ;;  %458 = vset.pattern.permute.xlu2 %v472_v0  ;;  %v60_v4 = vld [vmem:[%s721_s5 + $0x38] sm:$0xff]  ;;  %v59_v5 = vld [vmem:[%s721_s5 + $0x30] sm:$0xff]  ;;  %v474_v21 = vmov 0.0   ;;  %s475_s4 = smov 125  }
   0x2   :  { %v43_v2 = vld [vmem:[%s719_s3] sm:$0xff]  ;;  %v42_v3 = vmul.u32 8, %v41_v1  ;;  %73 = vmatpush.msra.mxu0 %v60_v4  ;;  %v58_v7 = vld [vmem:[%s721_s5 + $0x28] sm:$0xff]  ;;  %v56_v9 = vld [vmem:[%s721_s5 + $0x18] sm:$0xff]  ;;  %v46_v15 = vand.u32 127, %v45_v14 }
   0x3   :  { %v57_v8 = vld [vmem:[%s721_s5 + $0x20] sm:$0xff]  ;;  %v55_v10 = vld [vmem:[%s721_s5 + $0x10] sm:$0xff]  ;;  %v54_v12 = vld [vmem:[%s721_s5 + $0x8] sm:$0xff]  ;;  %v476_v39 = vmov 2102212464  }
   0x4   :  { %v44_v6 = vadd.s32 %v43_v2, %v42_v3  ;;  %74 = vmatpush.msra.mxu0 %v59_v5  ;;  %v573_v11 = vld [vmem:[%s724_s1] sm:$0xff]  ;;  %v324_v17 = vld [vmem:[%s726_s8 + $0x58] sm:$0x7f]  ;;  %v323_v20 = vld [vmem:[%s726_s8 + $0x50] sm:$0xff]  ;;  %v477_v41 = vmov 920167782  }
   0x5   :  { %v53_v13 = vld [vmem:[%s721_s5] sm:$0xff]  ;;  %v273_v18 = vld [vmem:[%s726_s8 + $0x38] sm:$0xff]  ;;  %441 = vmatpush.msk.msra.mxu3 %vm329_vm0, %v324_v17  ;;  %v478_v44 = vmov 1326507024   ;;  %v479_v46 = vmov 683565275  }
   0x6   :  { %48 = vperm.xlu0 %457, %v44_v6   ;;  %75 = vmatpush.msra.mxu0 %v58_v7  ;;  %v585_v16 = vld [vmem:[%s725_s10] ss:$0 sm:$0xff]  ;;  %s473_s10 = smov 126   ;;  %v480_v48 = vmov 2475754826  }
   0x7   :  { %311 = vmatpush.msra.mxu2 %v273_v18  ;;  %258 = vrot.lane.b32.xlu1 %v585_v16, %s473_s10  ;;  %v459_v23 = vld [vmem:[%s722_s6] ss:$0 sm:$0xff]  ;;  %v481_v51 = vmov 2131351028  }
   0x8   :  { %76 = vmatpush.msra.mxu0 %v57_v8  ;;  %348 = vmatpush.msra.mxu3 %v323_v20  ;;  %v460_v24 = vld [vmem:[%s723_s7] ss:$0 sm:$0xff] }
   0xa   :  { %77 = vmatpush.msra.mxu0 %v56_v9 }
   0xc   :  { %78 = vmatpush.msra.mxu0 %v55_v10 }
   0xe   :  { %89 = vperm.xlu0 %457, %v573_v11   ;;  %79 = vmatpush.msra.mxu0 %v54_v12 }
   0xf   :  { %262 = vrot.lane.b32.xlu1 %v585_v16, %s475_s4  ;;  %s483_s4 = smov 2  }
  0x10   :  { %80 = vmatpush.msra.mxu0 %v53_v13 }
  0x78   :  { %v49_v19 = vpop.permute.xlu0 %48 }
  0x79   :  { %vm50_vm2 = vcmp.eq.s32.totalorder %v46_v15, %v49_v19 }
  0x7a   :  { %v434_v22 = vsel %vm50_vm2, 1.0, %v474_v21 }
  0x7b   :  { %435 = vmatmul.msk.f32.vlgmr.msra.gmra.mxu0 %vm61_vm1, %v434_v22 }
  0x80   :  { %v90_v25 = vpop.permute.xlu0 %89 }
  0x81   :  { %v95_v26 = vmul.f32 %v459_v23, %v90_v25 }
  0x83   :  { %v606_v27 = vadd.f32 %v460_v24, %v95_v26 }
  0x85   :  { %v104_v28 = vand.u32 2139095040, %v606_v27  ;;  %v101_v31 = vand.u32 2147483647, %v606_v27  ;;  %vm103_vm15 = vcmp.lt.s32.totalorder %v606_v27, 0 }
  0x87   :  { %v105_v29 = vshrl.u32 %v104_v28, 23  ;;  %v108_v33 = vand.u32 8388607, %v101_v31  ;;  %vm683_vm0 = vcmp.le.f32.partialorder %v101_v31, 0.7853982  ;;  %v38_v31 = vld [vmem:[%s727_s0] sm:$0xff] }
  0x88   :  { %s482_s0 = smov 1  }
  0x89   :  { %v436_v30 = vadd.s32 4294967169, %v105_v29  ;;  %v109_v37 = vor.u32 8388608, %v108_v33  ;;  %400 = vrot.lane.b32.xlu1 %v585_v16, %s482_s0 }
  0x8b   :  { %v111_v32 = vadd.s32 1, %v436_v30  ;;  %v621_v58 = vshll.u32 %v109_v37, 8 }
  0x8d   :  { %vm112_vm3 = vcmp.gt.s32.totalorder %v111_v32, 0  ;;  %v150_v5 = vand.u32 65535, %v621_v58  ;;  %v151_v7 = vshrl.u32 %v621_v58, 16 }
  0x8e   :  { %v113_v34 = vsel %vm112_vm3, %v111_v32, 0 }
  0x8f   :  { %v115_v35 = vand.u32 31, %v113_v34  ;;  %v614_v38 = vshrl.u32 %v113_v34, 5 }
  0x91   :  { %v612_v36 = vsub.s32 32, %v115_v35  ;;  %v127_v40 = vshll.u32 %v476_v39, %v115_v35  ;;  %v130_v42 = vshll.u32 %v477_v41, %v115_v35  ;;  %v118_v47 = vshll.u32 %v479_v46, %v115_v35 }
  0x92   :  { %v121_v50 = vshll.u32 %v480_v48, %v115_v35  ;;  %v124_v53 = vshll.u32 %v481_v51, %v115_v35  ;;  %vm136_vm4 = vcmp.lt.s32.totalorder %v614_v38, 4  ;;  %vm133_vm5 = vcmp.lt.s32.totalorder %v614_v38, 1 }
  0x93   :  { %v128_v43 = vshrl.u32 %v477_v41, %v612_v36  ;;  %v131_v45 = vshrl.u32 %v478_v44, %v612_v36  ;;  %v119_v49 = vshrl.u32 %v480_v48, %v612_v36  ;;  %v122_v52 = vshrl.u32 %v481_v51, %v612_v36 }
  0x94   :  { %v125_v54 = vshrl.u32 %v476_v39, %v612_v36  ;;  %vm135_vm6 = vcmp.lt.s32.totalorder %v614_v38, 3  ;;  %vm134_vm7 = vcmp.lt.s32.totalorder %v614_v38, 2  ;;  %v117_v34 = vshrl.u32 %v479_v46, %v612_v36 }
  0x95   :  { %v129_v55 = vor.u32 %v128_v43, %v127_v40  ;;  %v132_v56 = vor.u32 %v131_v45, %v130_v42  ;;  %v120_v57 = vor.u32 %v119_v49, %v118_v47  ;;  %v123_v59 = vor.u32 %v122_v52, %v121_v50 }
  0x96   :  { %v126_v60 = vor.u32 %v125_v54, %v124_v53 }
  0x97   :  { %v142_v61 = vsel %vm136_vm4, %v129_v55, 920167782  ;;  %v146_v62 = vsel %vm136_vm4, %v132_v56, 1326507024  ;;  %v141_v63 = vsel %vm133_vm5, %v120_v57, %v123_v59  ;;  %v137_v42 = vsel %vm133_vm5, %v117_v34, %v120_v57 }
  0x98   :  { %v143_v1 = vsel %vm135_vm6, %v126_v60, %v142_v61  ;;  %v145_v2 = vsel %vm133_vm5, %v123_v59, %v126_v60  ;;  %v147_v4 = vsel %vm135_vm6, %v129_v55, %v146_v62  ;;  %v138_v30 = vsel %vm136_vm4, %v126_v60, 2102212464 }
  0x99   :  { %v144_v3 = vsel %vm134_vm7, %v141_v63, %v143_v1  ;;  %v148_v6 = vsel %vm134_vm7, %v145_v2, %v147_v4  ;;  %v139_v43 = vsel %vm135_vm6, %v123_v59, %v138_v30  ;;  %vm325_vm4 = vcmask 121856  }
  0x9a   :  { %v174_v8 = vand.u32 65535, %v144_v3  ;;  %v175_v9 = vshrl.u32 %v144_v3, 16  ;;  %v152_v10 = vand.u32 65535, %v148_v6  ;;  %v153_v12 = vshrl.u32 %v148_v6, 16 }
  0x9b   :  { %v140_v46 = vsel %vm134_vm7, %v137_v42, %v139_v43  ;;  %v274_v43 = vld [vmem:[%s726_s8 + $0x40] sm:$0xff]  ;;  %vm244_vm5 = vweird.f32 %v606_v27  ;;  %vm276_vm6 = vcmask 130048  }
  0x9c   :  { %v177_v13 = vmul.u32 %v175_v9, %v150_v5  ;;  %v178_v14 = vmul.u32 %v174_v8, %v151_v7  ;;  %v155_v15 = vmul.u32 %v153_v12, %v150_v5  ;;  %v156_v17 = vmul.u32 %v152_v10, %v151_v7 }
  0x9d   :  { %v176_v18 = vmul.u32 %v174_v8, %v150_v5  ;;  %v154_v20 = vmul.u32 %v152_v10, %v150_v5  ;;  %v179_v22 = vmul.u32 %v175_v9, %v151_v7  ;;  %v157_v23 = vmul.u32 %v153_v12, %v151_v7  ;;  %v272_v9 = vld [vmem:[%s726_s8 + $0x30] sm:$0xff]  ;;  %v271_v10 = vld [vmem:[%s726_s8 + $0x28] sm:$0xff] }
  0x9e   :  { %v180_v19 = vshll.u32 %v177_v13, 16  ;;  %v158_v21 = vshll.u32 %v155_v15, 16  ;;  %v182_v24 = vshll.u32 %v178_v14, 16  ;;  %v160_v26 = vshll.u32 %v156_v17, 16  ;;  %312 = vmatpush.msra.mxu2 %v272_v9 }
  0x9f   :  { %v181_v40 = vshrl.u32 %v177_v13, 16  ;;  %v159_v44 = vshrl.u32 %v155_v15, 16  ;;  %v183_v47 = vshrl.u32 %v178_v14, 16  ;;  %v161_v49 = vshrl.u32 %v156_v17, 16  ;;  %v270_v13 = vld [vmem:[%s726_s8 + $0x20] sm:$0xff]  ;;  %v275_v14 = vld [vmem:[%s726_s8 + $0x48] sm:$0xff] }
  0xa0   :  { %vm184_vm8 = vc.u32 %v176_v18, %v180_v19  ;;  %v186_v25 = vadd.s32 %v180_v19, %v176_v18  ;;  %vm162_vm9 = vc.u32 %v154_v20, %v158_v21  ;;  %v164_v28 = vadd.s32 %v158_v21, %v154_v20  ;;  %313 = vmatpush.msra.mxu2 %v271_v10  ;;  %v269_v18 = vld [vmem:[%s726_s8 + $0x18] sm:$0xff]  ;;  %v268_v20 = vld [vmem:[%s726_s8 + $0x10] sm:$0xff] }
  0xa1   :  { %v185_v29 = vsel %vm184_vm8, 1, %v472_v0  ;;  %v163_v32 = vsel %vm162_vm9, 1, %v472_v0  ;;  %v194_v53 = vmul.u32 %v621_v58, %v140_v46  ;;  %294 = vmatpush.msra.mxu1 %v275_v14 }
  0xa2   :  { %v187_v33 = vadd.s32 %v185_v29, %v179_v22  ;;  %vm188_vm10 = vc.u32 %v186_v25, %v182_v24  ;;  %v165_v35 = vadd.s32 %v163_v32, %v157_v23  ;;  %vm166_vm11 = vc.u32 %v164_v28, %v160_v26  ;;  %314 = vmatpush.msra.mxu2 %v270_v13  ;;  %v267_v22 = vld [vmem:[%s726_s8 + $0x8] sm:$0xff]  ;;  %v266_v28 = vld [vmem:[%s726_s8] sm:$0xff] }
  0xa3   :  { %v189_v37 = vsel %vm188_vm10, 1, %v472_v0  ;;  %v167_v39 = vsel %vm166_vm11, 1, %v472_v0  ;;  %v190_v0 = vadd.s32 %v186_v25, %v182_v24  ;;  %295 = vmatpush.msra.mxu1 %v274_v43 }
  0xa4   :  { %v191_v41 = vadd.s32 %v189_v37, %v187_v33  ;;  %v169_v45 = vadd.s32 %v167_v39, %v165_v35  ;;  %315 = vmatpush.msra.mxu2 %v269_v18 }
  0xa6   :  { %v192_v48 = vadd.s32 %v191_v41, %v181_v40  ;;  %v170_v36 = vadd.s32 %v169_v45, %v159_v44  ;;  %316 = vmatpush.msra.mxu2 %v268_v20 }
  0xa8   :  { %v193_v50 = vadd.s32 %v192_v48, %v183_v47  ;;  %v171_v51 = vadd.s32 %v170_v36, %v161_v49  ;;  %317 = vmatpush.msra.mxu2 %v267_v22 }
  0xaa   :  { %v197_v52 = vadd.s32 1, %v193_v50  ;;  %vm196_vm12 = vc.u32 %v171_v51, %v190_v0  ;;  %v195_v2 = vadd.s32 %v190_v0, %v171_v51  ;;  %318 = vmatpush.msra.mxu2 %v266_v28 }
  0xab   :  { %440 = vmatmul.msk.f32.vlgmr.msra.gmra.mxu2 %vm61_vm1, %v38_v31 }
  0xac   :  { %v198_v54 = vsel %vm196_vm12, %v197_v52, %v193_v50 }
  0xad   :  { %v199_v55 = vadd.s32 %v198_v54, %v194_v53 }
  0xaf   :  { %v200_v56 = vadd.s32 536870912, %v199_v55 }
  0xb1   :  { %v201_v57 = vshrl.u32 %v200_v56, 30 }
  0xb3   :  { %v202_v59 = vshll.u32 %v201_v57, 30  ;;  %v225_v25 = vsub.s32 4, %v201_v57 }
  0xb5   :  { %v203_v60 = vsub.s32 %v199_v55, %v202_v59  ;;  %v226_v33 = vsel %vm103_vm15, %v225_v25, %v201_v57  ;;  %v259_v55 = vpop.permute.xlu1 %258 }
  0xb6   :  { %v228_v37 = vsel %vm683_vm0, 0, %v226_v33  ;;  %v261_v56 = vmul.f32 %v259_v55, %v573_v11 }
  0xb7   :  { %vm204_vm13 = vcmp.lt.s32.totalorder %v203_v60, 0  ;;  %v205_v61 = vsub.s32 0, %v203_v60  ;;  %v245_v44 = vadd.s32 3, %v228_v37 }
  0xb9   :  { %v206_v62 = vsel %vm204_vm13, %v205_v61, %v203_v60  ;;  %v246_v36 = vand.u32 3, %v245_v44  ;;  %vm428_vm13 = vcmask 7168  }
  0xba   :  { %v207_v63 = vclz %v206_v62 }
  0xbb   :  { %vm248_vm1 = vcmp.eq.s32.totalorder %v246_v36, 0  ;;  %vm251_vm2 = vcmp.eq.s32.totalorder %v246_v36, 2  ;;  %vm247_vm3 = vcmp.lt.s32.totalorder %v246_v36, 2 }
  0xbc   :  { %v437_v1 = vadd.s32 4294967294, %v207_v63 }
  0xbd   :  { %v263_v57 = vpop.permute.xlu1 %262 }
  0xbe   :  { %vm438_vm14 = vcmp.lt.s32.totalorder %v437_v1, 0  ;;  %v265_v59 = vadd.f32 %v263_v57, %v261_v56 }
  0xbf   :  { %v210_v38 = vsel %vm438_vm14, 0, %v437_v1 }
  0xc0   :  { %v211_v3 = vsub.s32 32, %v210_v38  ;;  %v215_v4 = vsub.s32 4294967266, %v210_v38  ;;  %v212_v5 = vshll.u32 %v203_v60, %v210_v38  ;;  %357 = vperm.xlu2 %458, %v265_v59  }
  0xc2   :  { %v213_v6 = vshrl.u32 %v195_v2, %v211_v3  ;;  %v216_v58 = vadd.s32 127, %v215_v4  ;;  %v463_v3 = vld [vmem:[%s728_s9] ss:$0 sm:$0xff] }
  0xc4   :  { %v214_v7 = vor.u32 %v213_v6, %v212_v5  ;;  %v217_v8 = vshll.u32 %v216_v58, 23 }
  0xc6   :  { %v218_v12 = vor.u32 4788187, %v217_v8  ;;  %v221_v17 = vcvt.s32.f32 %v214_v7 }
  0xc8   :  { %v219_v15 = vand.u32 2147483647, %v218_v12 }
  0xca   :  { %v222_v19 = vmul.f32 %v221_v17, %v219_v15 }
  0xcc   :  { %v223_v21 = vxor.u32 2147483648, %v222_v19 }
  0xce   :  { %v224_v24 = vsel %vm103_vm15, %v223_v21, %v222_v19 }
  0xcf   :  { %v227_v26 = vsel %vm683_vm0, %v606_v27, %v224_v24  ;;  %v462_v27 = vld [vmem:[%s726_s8 + $0x5f] ss:$0 sm:$0xff] }
  0xd0   :  { %v229_v29 = vmul.f32 %v227_v26, %v227_v26 }
  0xd2   :  { %v230_v30 = vmul.f32 -0.001358992, %v229_v29  ;;  %v237_v32 = vmul.f32 -0.00019511016, %v229_v29 }
  0xd4   :  { %v231_v34 = vadd.f32 0.041655596, %v230_v30  ;;  %v238_v35 = vadd.f32 0.008332121, %v237_v32 }
  0xd6   :  { %v232_v39 = vmul.f32 %v231_v34, %v229_v29  ;;  %v239_v40 = vmul.f32 %v238_v35, %v229_v29 }
  0xd8   :  { %v233_v41 = vadd.f32 -0.4999988, %v232_v39  ;;  %v240_v42 = vadd.f32 -0.16666654, %v239_v40 }
  0xda   :  { %v234_v45 = vmul.f32 %v233_v41, %v229_v29  ;;  %v241_v47 = vmul.f32 %v240_v42, %v229_v29  ;;  %v40_v29 = vld [vmem:[%s729_s2] sm:$0xff] }
  0xdb   :  { %v399_v31 = vmul.f32 %v585_v16, %v40_v29 }
  0xdc   :  { %v235_v48 = vadd.f32 1.0, %v234_v45  ;;  %v242_v49 = vadd.f32 1.0, %v241_v47 }
  0xde   :  { %v243_v46 = vmul.f32 %v242_v49, %v227_v26  ;;  %v252_v50 = vxor.u32 2147483648, %v235_v48 }
  0xe0   :  { %v249_v51 = vxor.u32 2147483648, %v243_v46  ;;  %v253_v52 = vsel %vm251_vm2, %v252_v50, %v243_v46 }
  0xe2   :  { %v250_v0 = vsel %vm248_vm1, %v235_v48, %v249_v51 }
  0xe3   :  { %v254_v53 = vsel %vm247_vm3, %v250_v0, %v253_v52 }
  0xe4   :  { %v255_v54 = vsel %vm244_vm5, nan, %v254_v53 }
  0xe5   :  { %442 = vmatmul.msk.f32.vlgmr.msra.gmra.mxu3 %vm325_vm4, %v255_v54 }
  0xf8   :  { %v82_v60 = vpop.f32.mrf.mxu0 }
  0xf9   :  { %439 = vmatmul.msk.f32.vlgmr.msra.gmra.mxu1 %vm276_vm6, %v82_v60 }
  0xfb   :  { %v401_v25 = vpop.permute.xlu1 %400 }
 0x11a   :  { %v358_v62 = vpop.permute.xlu2 %357 }
 0x11b   :  { %v361_v2 = vmul.f32 %v462_v27, %v358_v62 }
 0x12e   :  { %v320_v61 = vpop.f32.mrf.mxu2 }
 0x168   :  { %v350_v38 = vpop.f32.mrf.mxu3 }
 0x176   :  { %v297_v63 = vpop.f32.mrf.mxu1 }
 0x177   :  { %v321_v1 = vadd.f32 %v320_v61, %v297_v63 }
 0x179   :  { %v353_v11 = vadd.f32 %v350_v38, %v321_v1 }
 0x17b   :  { %v362_v4 = vadd.f32 %v361_v2, %v353_v11 }
 0x17d   :  { %v367_v5 = vadd.f32 %v463_v3, %v362_v4 }
 0x17f   :  { %393 = vrot.lane.b32.xlu0 %v367_v5, %s482_s0  ;;  %388 = vrot.lane.b32.xlu2 %v367_v5, %s483_s4  ;;  %v443_v6 = vmul.f32 -1.442695, %v367_v5 }
 0x181   :  { %464 = vpow2.f32 %v443_v6 }
 0x187   :  { %v465_v58 = vpop.eup %464 }
 0x188   :  { %v371_v7 = vadd.f32 1.0, %v465_v58 }
 0x18a   :  { %466 = vrcp.f32 %v371_v7  ;;  %v383_v14 = vand.u32 2147483648, %v371_v7  ;;  %vm377_vm8 = vweird.f32 %v371_v7  ;;  %v381_v15 = vand.u32 2147483647, %v371_v7 }
 0x18c   :  { %v384_v18 = vor.u32 1.1754944e-38, %v383_v14  ;;  %vm382_vm10 = vcmp.eq.f32.partialorder %v381_v15, 8.507059e+37 }
 0x190   :  { %v467_v8 = vpop.eup %466 }
 0x191   :  { %v373_v9 = vmul.f32 %v467_v8, %v371_v7  ;;  %vm378_vm7 = vweird.f32 %v467_v8 }
 0x192   :  { %vm379_vm9 = vmor %vm377_vm8, %vm378_vm7 }
 0x193   :  { %v374_v10 = vsub.f32 1.0, %v373_v9 }
 0x195   :  { %v375_v12 = vmul.f32 %v467_v8, %v374_v10 }
 0x197   :  { %v376_v13 = vadd.f32 %v467_v8, %v375_v12 }
 0x199   :  { %v380_v17 = vsel %vm379_vm9, %v467_v8, %v376_v13 }
 0x19a   :  { %v385_v19 = vsel %vm382_vm10, %v384_v18, %v380_v17 }
 0x19b   :  { %v392_v21 = vsub.f32 1.0, %v385_v19 }
 0x1d9   :  { %v389_v20 = vpop.permute.xlu2 %388 }
 0x1da   :  { %v391_v23 = vmul.f32 %v389_v20, %v385_v19 }
 0x1f1   :  { %v394_v22 = vpop.permute.xlu0 %393 }
 0x1f2   :  { %v396_v24 = vmul.f32 %v394_v22, %v392_v21 }
 0x1f4   :  { %v397_v26 = vadd.f32 %v396_v24, %v391_v23 }
 0x1f6   :  { %v403_v28 = vmul.f32 %v401_v25, %v397_v26 }
 0x1f8   :  { %405 = vrot.lane.b32.xlu2 %v403_v28, %s473_s10 }
 0x252   :  { %v406_v30 = vpop.permute.xlu2 %405 }
 0x253   :  { %v408_v32 = vadd.f32 %v406_v30, %v399_v31 }
 0x255   :  { %v444_v33 = vmul.f32 -1.442695, %v408_v32 }
 0x257   :  { %468 = vpow2.f32 %v444_v33 }
 0x25d   :  { %v469_v34 = vpop.eup %468 }
 0x25e   :  { %v412_v35 = vadd.f32 1.0, %v469_v34 }
 0x260   :  { %470 = vrcp.f32 %v412_v35  ;;  %v424_v41 = vand.u32 2147483648, %v412_v35  ;;  %v422_v43 = vand.u32 2147483647, %v412_v35  ;;  %vm418_vm12 = vweird.f32 %v412_v35 }
 0x262   :  { %v425_v45 = vor.u32 1.1754944e-38, %v424_v41  ;;  %vm423_vm15 = vcmp.eq.f32.partialorder %v422_v43, 8.507059e+37 }
 0x266   :  { %v471_v37 = vpop.eup %470 }
 0x267   :  { %v414_v39 = vmul.f32 %v471_v37, %v412_v35  ;;  %vm419_vm11 = vweird.f32 %v471_v37 }
 0x268   :  { %vm420_vm14 = vmor %vm418_vm12, %vm419_vm11 }
 0x269   :  { %v415_v40 = vsub.f32 1.0, %v414_v39 }
 0x26b   :  { %v416_v42 = vmul.f32 %v471_v37, %v415_v40 }
 0x26d   :  { %v417_v44 = vadd.f32 %v471_v37, %v416_v42 }
 0x26f   :  { %v421_v16 = vsel %vm420_vm14, %v471_v37, %v417_v44 }
 0x270   :  { %v426_v47 = vsel %vm423_vm15, %v425_v45, %v421_v16 }
 0x271   :  { %429 = vst.msk [vmem:[%s730_s11] sm:$0xff] %vm428_vm13, %v426_v47 }

</bundles_post_ra>
